<compile_context>
chip_gen: v7x
topology: tpu7x:2x2x1
jax: 0.10.0
libtpu: 0.0.40
codegen_flags: <defaults>
</compile_context>

<pallas_src>
import functools

import jax
import jax.numpy as jnp
from jax.experimental import pallas as pl
from jax.experimental.pallas import tpu as pltpu


# ---------------------------------------------------------------------------
# Kernel
# ---------------------------------------------------------------------------
def _mmlp_kernel(
    x_ref,
    w1_ref, b1_ref,
    w2_ref, b2_ref,
    w3_ref, b3_ref,
    wo_ref, bo_ref,
    out_ref,
):
    # Blocks 1..3: Linear (BN pre-folded into W/b) -> ReLU. Dropout = identity (eval).
    # Matmul operands use the weight dtype (f32 or bf16); accumulation + bias add
    # + ReLU stay in f32.
    x = x_ref[...].astype(w1_ref.dtype)
    h = jnp.dot(x, w1_ref[...], preferred_element_type=jnp.float32) + b1_ref[...]
    h = jnp.maximum(h, 0.0)

    h = jnp.dot(h.astype(w2_ref.dtype), w2_ref[...],
                preferred_element_type=jnp.float32) + b2_ref[...]
    h = jnp.maximum(h, 0.0)

    h = jnp.dot(h.astype(w3_ref.dtype), w3_ref[...],
                preferred_element_type=jnp.float32) + b3_ref[...]
    h = jnp.maximum(h, 0.0)

    # Single fused output matmul: columns = [decoder | cls | reg | identity->h].
    # One full-width store instead of two lane-sparse stores / DMA streams.
    out = jnp.dot(h.astype(wo_ref.dtype), wo_ref[...],
                  preferred_element_type=jnp.float32) + bo_ref[...]
    out_ref[...] = out.astype(out_ref.dtype)


def _probe_kernel(w_ref, o_ref):
    o_ref[...] = w_ref[...] * 2.0


@functools.lru_cache(maxsize=1)
def _single_buffer_supported():
    """Probe (once) whether pipeline_mode=pl.Buffered(1) works for constant-index
    operands on this JAX/Mosaic install. Falls back to default double-buffering."""
    try:
        mode = pl.Buffered(1)
        with jax.ensure_compile_time_eval():
            probe = pl.pallas_call(
                _probe_kernel,
                grid=(2,),
                in_specs=[pl.BlockSpec((8, 128), lambda i: (0, 0),
                                       pipeline_mode=mode)],
                out_specs=pl.BlockSpec((8, 128), lambda i: (i, 0)),
                out_shape=jax.ShapeDtypeStruct((16, 128), jnp.float32),
            )
            jax.block_until_ready(probe(jnp.ones((8, 128), jnp.float32)))
        return True
    except Exception:
        return False


def _round_up(v, m):
    return ((v + m - 1) // m) * m


# ---------------------------------------------------------------------------
# Jitted impl (all config is static; wrapper below computes it in Python)
# ---------------------------------------------------------------------------
@functools.partial(
    jax.jit,
    static_argnames=("num_class_labels", "num_reg_labels", "block_b",
                     "out_dtype", "single_buffer_weights", "vmem_limit_bytes"))
def _mmlp_forward_impl(x, kp, *, num_class_labels, num_reg_labels, block_b,
                       out_dtype, single_buffer_weights, vmem_limit_bytes):
    B, D = x.shape
    NO = kp["wo"].shape[1]                      # D + C + R + H3 (fused output width)
    grid = (pl.cdiv(B, block_b),)

    def resident(shape):
        """Whole-array block, constant index_map: stays VMEM-resident across the grid.
        Single-buffered when supported (double-buffering a constant block only wastes
        VMEM -- matters for v7x's 64 MiB at realistic hidden sizes)."""
        zeros = (0,) * len(shape)
        if single_buffer_weights:
            return pl.BlockSpec(shape, lambda i: zeros, pipeline_mode=pl.Buffered(1))
        return pl.BlockSpec(shape, lambda i: zeros)

    in_specs = [
        # x tiled over batch. (If DMA remains exposed at large B, sweep
        # pipeline_mode=pl.Buffered(3) here -- cheap, tens of KB.)
        pl.BlockSpec((block_b, D), lambda i: (i, 0)),
        resident(kp["w1"].shape), resident(kp["b1"].shape),
        resident(kp["w2"].shape), resident(kp["b2"].shape),
        resident(kp["w3"].shape), resident(kp["b3"].shape),
        resident(kp["wo"].shape), resident(kp["bo"].shape),
    ]

    out = pl.pallas_call(
        _mmlp_kernel,
        grid=grid,
        in_specs=in_specs,
        out_specs=pl.BlockSpec((block_b, NO), lambda i: (i, 0)),
        out_shape=jax.ShapeDtypeStruct((B, NO), out_dtype),
        compiler_params=pltpu.CompilerParams(
            dimension_semantics=("parallel",),        # megacore-shard the B axis
            vmem_limit_bytes=vmem_limit_bytes),
    )(
        x,
        kp["w1"], kp["b1"],
        kp["w2"], kp["b2"],
        kp["w3"], kp["b3"],
        kp["wo"], kp["bo"],
    )

    C, R = num_class_labels, num_reg_labels
    decoder_output = out[:, :D]
    classification_output = out[:, D:D + C]
    regression_output = out[:, D + C:D + C + R]
    h = out[:, D + C + R:]
    return decoder_output, classification_output, regression_output, h


# ---------------------------------------------------------------------------
# Public wrapper (shape-dependent config computed in plain Python)
# ---------------------------------------------------------------------------
def mmlp_forward(x, kp, *, num_class_labels, num_reg_labels, block_b=None,
                 out_dtype=jnp.float32):
    """Fused forward. kp comes from fold_params(); returns (dec, cls, reg, h).

    For lowest HBM traffic pass x (and request out_dtype) as bf16 together with
    bf16 weights from fold_params(weight_dtype=jnp.bfloat16); accumulation and
    the bias/ReLU epilogue remain f32 inside the kernel.
    """
    B, D = x.shape
    NO = kp["wo"].shape[1]
    out_dtype = jnp.dtype(out_dtype).type
    x_bytes = jnp.dtype(x.dtype).itemsize
    o_bytes = jnp.dtype(out_dtype).itemsize
    # Sublane alignment for partial (non-full-array) batch tiles.
    sub = 16 if min(x_bytes, o_bytes) < 4 else 8

    if block_b is None:
        if B <= 64:
            block_b = B                               # single full block, no alignment issue
        else:
            # >= 2 grid steps (both v7x TCs busy), capped at 4096 rows; the kernel
            # is HBM/DMA-bound so big tiles amortize the ~0.35 us per-step overhead.
            block_b = min(_round_up(pl.cdiv(B, 2), sub), 4096)
            # Keep the double-buffered x/out tiles under ~16 MiB of VMEM.
            bytes_per_row = 2 * (D * x_bytes + NO * o_bytes)
            rows_cap = max(((16 << 20) // bytes_per_row) // sub * sub, sub)
            block_b = min(block_b, rows_cap)

    # Explicit VMEM accounting: 2x x-tile + 2x output tile + weights (counted
    # double-buffered to stay conservative even if single-buffering is active).
    w_bytes = sum(int(v.size) * jnp.dtype(v.dtype).itemsize for v in kp.values())
    need = (2 * block_b * D * x_bytes) + (2 * block_b * NO * o_bytes) + 2 * w_bytes
    vmem_limit_bytes = int(min(max(int(1.25 * need) + (2 << 20), 32 << 20), 64 << 20))

    return _mmlp_forward_impl(
        x, kp,
        num_class_labels=num_class_labels,
        num_reg_labels=num_reg_labels,
        block_b=int(block_b),
        out_dtype=out_dtype,
        single_buffer_weights=_single_buffer_supported(),
        vmem_limit_bytes=vmem_limit_bytes)


# ---------------------------------------------------------------------------
# Parameters (PyTorch-style raw params + host-side folding)
# ---------------------------------------------------------------------------
def init_params(key, input_dim, hidden_units, num_class_labels, num_reg_labels):
    """Raw params mirroring the PyTorch module (Linear weights are (out, in))."""
    def linear(k, fan_in, fan_out):
        kw, kb = jax.random.split(k)
        bound = 1.0 / jnp.sqrt(jnp.float32(fan_in))
        w = jax.random.uniform(kw, (fan_out, fan_in), jnp.float32, -bound, bound)
        b = jax.random.uniform(kb, (fan_out,), jnp.float32, -bound, bound)
        return {"w": w, "b": b}

    def batchnorm(k, n):
        # Non-trivial (as-if-trained) eval-mode stats so the folding is exercised.
        kg, kb, km, kv = jax.random.split(k, 4)
        return {
            "gamma": 1.0 + 0.1 * jax.random.normal(kg, (n,), jnp.float32),
            "beta": 0.1 * jax.random.normal(kb, (n,), jnp.float32),
            "mean": 0.1 * jax.random.normal(km, (n,), jnp.float32),
            "var": jax.random.uniform(kv, (n,), jnp.float32, 0.5, 1.5),
        }

    h1, h2, h3 = hidden_units
    keys = jax.random.split(key, 9)
    return {
        "fc1": linear(keys[0], input_dim, h1), "bn1": batchnorm(keys[1], h1),
        "fc2": linear(keys[2], h1, h2),        "bn2": batchnorm(keys[3], h2),
        "fc3": linear(keys[4], h2, h3),        "bn3": batchnorm(keys[5], h3),
        "fc_dec": linear(keys[6], h3, input_dim),
        "cls_head": linear(keys[7], h3, num_class_labels),
        "reg_head": linear(keys[8], h3, num_reg_labels),
    }


def fold_params(raw, *, bn_eps=1e-5, weight_dtype=jnp.float32):
    """Fold eval-mode BatchNorm into the Linear weights/biases, transpose weights
    to (in, out), and concatenate the head weights plus an identity block so one
    matmul emits [decoder | cls | reg | last-hidden-features]."""
    def fold(fc, bn):
        s = bn["gamma"] / jnp.sqrt(bn["var"] + bn_eps)           # (out,)
        t = bn["beta"] - bn["mean"] * s
        w = (fc["w"].T * s[None, :]).astype(weight_dtype)        # (in, out)
        b = (fc["b"] * s + t).reshape(1, -1).astype(jnp.float32)
        return w, b

    def plain(fc):
        return fc["w"].T, fc["b"].reshape(1, -1)

    w1, b1 = fold(raw["fc1"], raw["bn1"])
    w2, b2 = fold(raw["fc2"], raw["bn2"])
    w3, b3 = fold(raw["fc3"], raw["bn3"])
    wd, bd = plain(raw["fc_dec"])
    wc, bc = plain(raw["cls_head"])
    wr, br = plain(raw["reg_head"])
    h3 = wd.shape[0]
    eye = jnp.eye(h3, dtype=jnp.float32)                         # pass-through of h
    wo = jnp.concatenate([wd, wc, wr, eye], axis=1).astype(weight_dtype)
    bo = jnp.concatenate([bd, bc, br, jnp.zeros((1, h3), jnp.float32)],
                         axis=1).astype(jnp.float32)
    return dict(w1=w1, b1=b1, w2=w2, b2=b2, w3=w3, b3=b3, wo=wo, bo=bo)


def reference_forward(x, raw, *, bn_eps=1e-5):
    """Pure-JAX reference with exact PyTorch eval-mode semantics (unfolded)."""
    hp = jax.lax.Precision.HIGHEST

    def block(h, fc, bn):
        y = jnp.dot(h, fc["w"].T, precision=hp) + fc["b"]
        y = (y - bn["mean"]) / jnp.sqrt(bn["var"] + bn_eps) * bn["gamma"] + bn["beta"]
        return jnp.maximum(y, 0.0)

    h = block(x, raw["fc1"], raw["bn1"])
    h = block(h, raw["fc2"], raw["bn2"])
    h = block(h, raw["fc3"], raw["bn3"])
    dec = jnp.dot(h, raw["fc_dec"]["w"].T, precision=hp) + raw["fc_dec"]["b"]
    cls = jnp.dot(h, raw["cls_head"]["w"].T, precision=hp) + raw["cls_head"]["b"]
    reg = jnp.dot(h, raw["reg_head"]["w"].T, precision=hp) + raw["reg_head"]["b"]
    return dec, cls, reg, h


# ---------------------------------------------------------------------------
# Demo / self-test
# ---------------------------------------------------------------------------
if __name__ == "__main__":
    input_dim = 32
    hidden_units = (64, 64, 32)
    num_class_labels = 5
    num_reg_labels = 3

    key = jax.random.PRNGKey(0)
    k_x, k_x2, k_p = jax.random.split(key, 3)
    raw = init_params(k_p, input_dim, hidden_units, num_class_labels, num_reg_labels)
    kp_f32 = fold_params(raw, weight_dtype=jnp.float32)

    # --- Case 1: small batch, f32, exact vs unfolded eval-mode reference ------
    x_small = jax.random.normal(k_x, (8, input_dim), jnp.float32)
    outs = jax.block_until_ready(
        mmlp_forward(x_small, kp_f32, num_class_labels=num_class_labels,
                     num_reg_labels=num_reg_labels))
    refs = reference_forward(x_small, raw)
    for o, r in zip(outs, refs):
        assert o.shape == r.shape and o.dtype == jnp.float32
        assert jnp.allclose(o, r, atol=5e-4, rtol=5e-4), "f32 mismatch (B=8)"

    # --- Case 2: multi-step grid + partial last tile, f32 ---------------------
    x_big = jax.random.normal(k_x2, (200, input_dim), jnp.float32)
    outs2 = jax.block_until_ready(
        mmlp_forward(x_big, kp_f32, num_class_labels=num_class_labels,
                     num_reg_labels=num_reg_labels))
    refs2 = reference_forward(x_big, raw)
    for o, r in zip(outs2, refs2):
        assert o.shape == r.shape
        assert jnp.allclose(o, r, atol=5e-4, rtol=5e-4), "f32 mismatch (B=200)"

    # --- Case 3: bf16 I/O + bf16 weights (halved HBM traffic), real tolerance -
    kp_bf16 = fold_params(raw, weight_dtype=jnp.bfloat16)
    outs3 = jax.block_until_ready(
        mmlp_forward(x_big.astype(jnp.bfloat16), kp_bf16,
                     num_class_labels=num_class_labels,
                     num_reg_labels=num_reg_labels,
                     out_dtype=jnp.bfloat16))
    for o, r in zip(outs3, refs2):
        assert o.shape == r.shape and o.dtype == jnp.bfloat16
        assert jnp.allclose(o.astype(jnp.float32), r, atol=0.1, rtol=0.1), \
            "bf16 path drifted too far from f32 reference"

    print("KERNEL_OK")
</pallas_src>

<mosaic_0001>
module attributes {stable_mosaic.version = 11 : i64} {
  func.func @_probe_kernel(%arg0: i32, %arg1: memref<8x128xf32, #tpu.memory_space<vmem>>, %arg2: memref<8x128xf32, #tpu.memory_space<vmem>>) attributes {dimension_semantics = [#tpu.dimension_semantics<arbitrary>], iteration_bounds = array<i64: 2>, scalar_prefetch = 0 : i64, scratch_operands = 0 : i64, tpu.core_type = #tpu.core_type<tc>, window_params = [{pipeline_mode = #tpu.pipeline_mode<synchronous>, transform_indices = @transform_0, window_bounds = array<i64: 8, 128>}, {transform_indices = @transform_1, window_bounds = array<i64: 8, 128>}]} {
    %c0 = arith.constant 0 : index
    %c0_0 = arith.constant 0 : index
    %0 = vector.load %arg1[%c0, %c0_0] : memref<8x128xf32, #tpu.memory_space<vmem>>, vector<8x128xf32>
    %cst = arith.constant 2.000000e+00 : f32
    %1 = vector.broadcast %cst : f32 to vector<8x128xf32>
    %2 = arith.mulf %0, %1 : vector<8x128xf32>
    %c0_1 = arith.constant 0 : index
    %c0_2 = arith.constant 0 : index
    %3 = vector.load %arg2[%c0_1, %c0_2] : memref<8x128xf32, #tpu.memory_space<vmem>>, vector<8x128xf32>
    tpu.vector_store %arg2[%c0_1, %c0_2], %2 {strides = array<i32>} : memref<8x128xf32, #tpu.memory_space<vmem>>, vector<8x128xf32>,
    return
  }
  func.func @transform_0(%arg0: i32) -> (i32, i32) {
    %c0_i32 = arith.constant 0 : i32
    %c0_i32_0 = arith.constant 0 : i32
    %c0_i32_1 = arith.constant 0 : i32
    return %c0_i32, %c0_i32_0 : i32, i32
  }
  func.func @transform_1(%arg0: i32) -> (i32, i32) {
    %c0_i32 = arith.constant 0 : i32
    %c0_i32_0 = arith.constant 0 : i32
    return %arg0, %c0_i32 : i32, i32
  }
}

module attributes {stable_mosaic.version = 11 : i64} {
  func.func @_mmlp_kernel(%arg0: i32, %arg1: memref<8x32xf32, #tpu.memory_space<vmem>>, %arg2: memref<32x64xf32, #tpu.memory_space<vmem>>, %arg3: memref<1x64xf32, #tpu.memory_space<vmem>>, %arg4: memref<64x64xf32, #tpu.memory_space<vmem>>, %arg5: memref<1x64xf32, #tpu.memory_space<vmem>>, %arg6: memref<64x32xf32, #tpu.memory_space<vmem>>, %arg7: memref<1x32xf32, #tpu.memory_space<vmem>>, %arg8: memref<32x72xf32, #tpu.memory_space<vmem>>, %arg9: memref<1x72xf32, #tpu.memory_space<vmem>>, %arg10: memref<8x72xf32, #tpu.memory_space<vmem>>) attributes {dimension_semantics = [#tpu.dimension_semantics<parallel>], iteration_bounds = array<i64: 1>, scalar_prefetch = 0 : i64, scratch_operands = 0 : i64, tpu.core_type = #tpu.core_type<tc>, window_params = [{transform_indices = @transform_0, window_bounds = array<i64: 8, 32>}, {pipeline_mode = #tpu.pipeline_mode<synchronous>, transform_indices = @transform_1, window_bounds = array<i64: 32, 64>}, {pipeline_mode = #tpu.pipeline_mode<synchronous>, transform_indices = @transform_2, window_bounds = array<i64: 1, 64>}, {pipeline_mode = #tpu.pipeline_mode<synchronous>, transform_indices = @transform_3, window_bounds = array<i64: 64, 64>}, {pipeline_mode = #tpu.pipeline_mode<synchronous>, transform_indices = @transform_4, window_bounds = array<i64: 1, 64>}, {pipeline_mode = #tpu.pipeline_mode<synchronous>, transform_indices = @transform_5, window_bounds = array<i64: 64, 32>}, {pipeline_mode = #tpu.pipeline_mode<synchronous>, transform_indices = @transform_6, window_bounds = array<i64: 1, 32>}, {pipeline_mode = #tpu.pipeline_mode<synchronous>, transform_indices = @transform_7, window_bounds = array<i64: 32, 72>}, {pipeline_mode = #tpu.pipeline_mode<synchronous>, transform_indices = @transform_8, window_bounds = array<i64: 1, 72>}, {transform_indices = @transform_9, window_bounds = array<i64: 8, 72>}]} {
    %c0 = arith.constant 0 : index
    %c0_0 = arith.constant 0 : index
    %0 = vector.load %arg1[%c0, %c0_0] : memref<8x32xf32, #tpu.memory_space<vmem>>, vector<8x32xf32>
    %c0_1 = arith.constant 0 : index
    %c0_2 = arith.constant 0 : index
    %1 = vector.load %arg2[%c0_1, %c0_2] : memref<32x64xf32, #tpu.memory_space<vmem>>, vector<32x64xf32>
    %cst = arith.constant dense<0.000000e+00> : vector<8x64xf32>
    %2 = tpu.matmul %0, %1, %cst {dimension_numbers = #tpu.dot_dimension_numbers<[1], [0], [0], [1], [0, 0, 1, 1], [], []>} : vector<8x32xf32>, vector<32x64xf32>, vector<8x64xf32> -> vector<8x64xf32>
    %c0_3 = arith.constant 0 : index
    %c0_4 = arith.constant 0 : index
    %3 = vector.load %arg3[%c0_3, %c0_4] : memref<1x64xf32, #tpu.memory_space<vmem>>, vector<1x64xf32>
    %4 = vector.broadcast %3 : vector<1x64xf32> to vector<8x64xf32>
    %5 = arith.addf %2, %4 : vector<8x64xf32>
    %cst_5 = arith.constant 0.000000e+00 : f32
    %6 = vector.broadcast %cst_5 : f32 to vector<8x64xf32>
    %7 = arith.maximumf %5, %6 : vector<8x64xf32>
    %c0_6 = arith.constant 0 : index
    %c0_7 = arith.constant 0 : index
    %8 = vector.load %arg4[%c0_6, %c0_7] : memref<64x64xf32, #tpu.memory_space<vmem>>, vector<64x64xf32>
    %cst_8 = arith.constant dense<0.000000e+00> : vector<8x64xf32>
    %9 = tpu.matmul %7, %8, %cst_8 {dimension_numbers = #tpu.dot_dimension_numbers<[1], [0], [0], [1], [0, 0, 1, 1], [], []>} : vector<8x64xf32>, vector<64x64xf32>, vector<8x64xf32> -> vector<8x64xf32>
    %c0_9 = arith.constant 0 : index
    %c0_10 = arith.constant 0 : index
    %10 = vector.load %arg5[%c0_9, %c0_10] : memref<1x64xf32, #tpu.memory_space<vmem>>, vector<1x64xf32>
    %11 = vector.broadcast %10 : vector<1x64xf32> to vector<8x64xf32>
    %12 = arith.addf %9, %11 : vector<8x64xf32>
    %cst_11 = arith.constant 0.000000e+00 : f32
    %13 = vector.broadcast %cst_11 : f32 to vector<8x64xf32>
    %14 = arith.maximumf %12, %13 : vector<8x64xf32>
    %c0_12 = arith.constant 0 : index
    %c0_13 = arith.constant 0 : index
    %15 = vector.load %arg6[%c0_12, %c0_13] : memref<64x32xf32, #tpu.memory_space<vmem>>, vector<64x32xf32>
    %cst_14 = arith.constant dense<0.000000e+00> : vector<8x32xf32>
    %16 = tpu.matmul %14, %15, %cst_14 {dimension_numbers = #tpu.dot_dimension_numbers<[1], [0], [0], [1], [0, 0, 1, 1], [], []>} : vector<8x64xf32>, vector<64x32xf32>, vector<8x32xf32> -> vector<8x32xf32>
    %c0_15 = arith.constant 0 : index
    %c0_16 = arith.constant 0 : index
    %17 = vector.load %arg7[%c0_15, %c0_16] : memref<1x32xf32, #tpu.memory_space<vmem>>, vector<1x32xf32>
    %18 = vector.broadcast %17 : vector<1x32xf32> to vector<8x32xf32>
    %19 = arith.addf %16, %18 : vector<8x32xf32>
    %cst_17 = arith.constant 0.000000e+00 : f32
    %20 = vector.broadcast %cst_17 : f32 to vector<8x32xf32>
    %21 = arith.maximumf %19, %20 : vector<8x32xf32>
    %c0_18 = arith.constant 0 : index
    %c0_19 = arith.constant 0 : index
    %22 = vector.load %arg8[%c0_18, %c0_19] : memref<32x72xf32, #tpu.memory_space<vmem>>, vector<32x72xf32>
    %cst_20 = arith.constant dense<0.000000e+00> : vector<8x72xf32>
    %23 = tpu.matmul %21, %22, %cst_20 {dimension_numbers = #tpu.dot_dimension_numbers<[1], [0], [0], [1], [0, 0, 1, 1], [], []>} : vector<8x32xf32>, vector<32x72xf32>, vector<8x72xf32> -> vector<8x72xf32>
    %c0_21 = arith.constant 0 : index
    %c0_22 = arith.constant 0 : index
    %24 = vector.load %arg9[%c0_21, %c0_22] : memref<1x72xf32, #tpu.memory_space<vmem>>, vector<1x72xf32>
    %25 = vector.broadcast %24 : vector<1x72xf32> to vector<8x72xf32>
    %26 = arith.addf %23, %25 : vector<8x72xf32>
    %c0_23 = arith.constant 0 : index
    %c0_24 = arith.constant 0 : index
    %27 = vector.load %arg10[%c0_23, %c0_24] : memref<8x72xf32, #tpu.memory_space<vmem>>, vector<8x72xf32>
    tpu.vector_store %arg10[%c0_23, %c0_24], %26 {strides = array<i32>} : memref<8x72xf32, #tpu.memory_space<vmem>>, vector<8x72xf32>,
    return
  }
  func.func @transform_0(%arg0: i32) -> (i32, i32) {
    %c0_i32 = arith.constant 0 : i32
    %c0_i32_0 = arith.constant 0 : i32
    return %arg0, %c0_i32 : i32, i32
  }
  func.func @transform_1(%arg0: i32) -> (i32, i32) {
    %c0_i32 = arith.constant 0 : i32
    %c0_i32_0 = arith.constant 0 : i32
    %c0_i32_1 = arith.constant 0 : i32
    return %c0_i32, %c0_i32_0 : i32, i32
  }
  func.func @transform_2(%arg0: i32) -> (i32, i32) {
    %c0_i32 = arith.constant 0 : i32
    %c0_i32_0 = arith.constant 0 : i32
    %c0_i32_1 = arith.constant 0 : i32
    return %c0_i32, %c0_i32_0 : i32, i32
  }
  func.func @transform_3(%arg0: i32) -> (i32, i32) {
    %c0_i32 = arith.constant 0 : i32
    %c0_i32_0 = arith.constant 0 : i32
    %c0_i32_1 = arith.constant 0 : i32
    return %c0_i32, %c0_i32_0 : i32, i32
  }
  func.func @transform_4(%arg0: i32) -> (i32, i32) {
    %c0_i32 = arith.constant 0 : i32
    %c0_i32_0 = arith.constant 0 : i32
    %c0_i32_1 = arith.constant 0 : i32
    return %c0_i32, %c0_i32_0 : i32, i32
  }
  func.func @transform_5(%arg0: i32) -> (i32, i32) {
    %c0_i32 = arith.constant 0 : i32
    %c0_i32_0 = arith.constant 0 : i32
    %c0_i32_1 = arith.constant 0 : i32
    return %c0_i32, %c0_i32_0 : i32, i32
  }
  func.func @transform_6(%arg0: i32) -> (i32, i32) {
    %c0_i32 = arith.constant 0 : i32
    %c0_i32_0 = arith.constant 0 : i32
    %c0_i32_1 = arith.constant 0 : i32
    return %c0_i32, %c0_i32_0 : i32, i32
  }
  func.func @transform_7(%arg0: i32) -> (i32, i32) {
    %c0_i32 = arith.constant 0 : i32
    %c0_i32_0 = arith.constant 0 : i32
    %c0_i32_1 = arith.constant 0 : i32
    return %c0_i32, %c0_i32_0 : i32, i32
  }
  func.func @transform_8(%arg0: i32) -> (i32, i32) {
    %c0_i32 = arith.constant 0 : i32
    %c0_i32_0 = arith.constant 0 : i32
    %c0_i32_1 = arith.constant 0 : i32
    return %c0_i32, %c0_i32_0 : i32, i32
  }
  func.func @transform_9(%arg0: i32) -> (i32, i32) {
    %c0_i32 = arith.constant 0 : i32
    %c0_i32_0 = arith.constant 0 : i32
    return %arg0, %c0_i32 : i32, i32
  }
}

</mosaic_0001>

<bundles_post_ra>
// kernel: tpu_custom_call.1
= control target key start
LH: loop header
LB: loop body
LE: loop exit
PB: predicated region body
PF: predicated region fallthrough
CT: control target
= control target key end

     0   :  { %6 = vsyncpa [#allocation3], 0  ;;  %s482_s0 = inlined_call_operand.hbm [shape: f32[8,128], index: 0, kind: input, shape index: {}]   ;;  %s483_s1 = inlined_call_operand.hbm [shape: f32[16,128], index: 1, kind: output, shape index: {}]  }
   0x1   :  { %7 = vsyncpa [#allocation4], 0 }
   0x2   :  { %9 = vsyncpa [#allocation4 + $0x1], 0  ;;  %s352_s6 = smov 0   ;;  %s354_s7 = smov 0  }
   0x3   :  { %s356_s8 = smov 0   ;;  %s358_s9 = smov 0  }
   0x4 LB: > { %s373_s10 = sadd.s32 4294967295, %s338_s9   ;;  %s184_s11 = sadd.s32 4294967294, %s338_s9   ;;  %s338_s9 = sphi %s358_s9, %s499_s9   ;;  %s334_s8 = sphi %s356_s8, %s498_s8   ;;  %s330_s7 = sphi %s354_s7, %s497_s7   ;;  %s326_s6 = sphi %s352_s6, %s496_s6  }
   0x5   : > { %s377_s12 = sadd.s32 1, %s338_s9   ;;  %s43_s13 = sadd.s32 1, %s334_s8 }
   0x6   : > { %s40_s14 = ssub.s32 %s338_s9, %s377_s12  ;;  %p53_p0 = scmp.ne.s32.totalorder %s334_s8, %s330_s7 }
   0x7   : > { %p41_p1 = scmp.eq.s32.totalorder %s40_s14, 0  ;;  %p54_p2 = scmp.eq.s32.totalorder %s373_s10, 1 }
   0x8   : > { %p59_p3 = scmp.ne.s32.totalorder %s330_s7, %s326_s6  ;;  %p60_p4 = scmp.eq.s32.totalorder %s184_s11, 1 }
   0x9   : > { %s388_s15 = scalar_select %p41_p1, %s334_s8, %s43_s13  }
   0xa   : > { %p390_p5 = por %p54_p2, %p53_p0  ;;  %p394_p6 = por %p60_p4, %p59_p3 }
   0xb   : > { %p185_p7 = scmp.ge.s32.totalorder %s338_s9, 1  ;;  %p67_p8 = scmp.lt.s32.totalorder %s338_s9, 3 }
   0xc   : > { %s487_s16 = scalar_select %p390_p5, 1, 0 }
   0xd   : > { %s488_s17 = scalar_select %p394_p6, 1, 0 }
   0xe   : > { %p484_p9 = scmp.eq.s32.totalorder %s373_s10, 0  ;;  %p401_p10 = pnand %p185_p7, %p67_p8 }
   0xf   : > { %s340_s19 = smov [#allocation2]   ;;  %s244_s24 = scalar_lea.hbm %s482_s0, 128 }
  0x10   : > { %s489_s18 = scalar_select %p401_p10, 1, 0 }
  0x11   : > { %s80_s20 = sshll.u32 %s340_s19, 4  ;;  %p200_p11 = pneg %p401_p10  ;;  %s81_s20 = int_to_ptr.vmem [resolvable:$true] %s80_s20 }
  0x12   : > { %p245_p13 = scmp.ne.s32.totalorder %s482_s0, %s244_s24  ;;  %p251_p3 = scmp.lt.u32.totalorder %s244_s24, %s482_s0 }
  0x13   : > { %p409_p12 = pnand %p484_p9, %p200_p11 }
  0x15   : > { %p246_p0 = pneg %p409_p12 }
  0x17   : > { %p247_p1 = pnand %p246_p0, %p245_p13 }
  0x19   : > { %p248_p2 = pneg %p247_p1 }
  0x1b   : > { %p253_p4 = pnand %p251_p3, %p248_p2 }
  0x1d   : > { %256 = shalt.err (!%p253_p4)
}
  0x1e   : > { %s257_s29 = scalar_lea.vmem %s81_s20, 128  ;;  %p265_p9 = scmp.lt.s32.totalorder %s81_s20, %s81_s20 }
  0x1f   : > { %p258_p7 = scmp.ne.s32.totalorder %s81_s20, %s257_s29  ;;  %p266_p6 = scmp.lt.s32.totalorder %s257_s29, %s257_s29 }
  0x21   : > { %p260_p8 = pnand %p258_p7, %p246_p0  ;;  %p267_p5 = por %p266_p6, %p265_p9 }
  0x23   : > { %p261_p11 = pneg %p260_p8 }
  0x25   : > { %p268_p10 = pnand %p267_p5, %p261_p11 }
  0x27   : > { %271 = shalt.err (!%p268_p10)
}
  0x28   : > { %203 = dma.hbm_to_vmem [thread:$0]  (!%p409_p12), %s482_s0, 128, %s81_s20, [#allocation3]  }
  0x29   : > { %p491_p13 = scmp.ne.s32.totalorder %s489_s18, 0 }
  0x2a   : > { %p492_p1 = scmp.eq.s32.totalorder (!%p491_p13), %s373_s10, 0 }
  0x2b   : > { %93 = sbr.rel (%p491_p13) target bundleno = 77 (0x4d), region = 24 }
  0x32   : > { %317 = dma.done.wait (%p492_p1), [#allocation3], 128   ;;  %p493_p0 = pmov %p492_p1 }
  0x33   : > { %s105_s3 = sand.u32 1, %s330_s7   ;;  %s191_s13 = sshll.u32 %s373_s10, 7  ;;  %v108_v0 = vld [vmem:[#allocation2] sm:$0xff] }
  0x34   : > { %319 = vsyncadd (%p493_p0), [#allocation3], 4294967168  ;;  %s189_s4 = sshll.u32 %s105_s3, 3  ;;  %v109_v1 = vmul.f32 2.0, %v108_v0  ;;  %s442_s19 = scalar_lea.hbm %s483_s1, %s191_s13 }
  0x35   : > { %s107_s5 = scalar_lea.vmem [#allocation5], %s189_s4  ;;  %s112_s20 = scalar_lea.sflag [#allocation4], %s105_s3 }
  0x36   : > { %s125_s11 = sshll.u32 %s107_s5, 4  ;;  %110 = vst [vmem:[%s107_s5] sm:$0xff] %v109_v1  ;;  %p494_p6 = scmp.ne.s32.totalorder %s487_s16, 0  ;;  %s437_s11 = int_to_ptr.vmem [resolvable:$true] %s125_s11 }
  0x37   : > { %s272_s21 = scalar_lea.vmem %s437_s11, 128  ;;  %s341_s10 = smov [#allocation5]  }
  0x38   : > { %p273_p5 = scmp.ne.s32.totalorder %s437_s11, %s272_s21  ;;  %s276_s22 = sshll.u32 %s341_s10, 4  ;;  %s277_s22 = int_to_ptr.vmem [resolvable:$false] %s276_s22 }
  0x39   : > { %s278_s23 = scalar_lea.vmem %s277_s22, 256  ;;  %p279_p12 = scmp.lt.s32.totalorder %s437_s11, %s277_s22 }
  0x3a   : > { %p274_p9 = pnand %p273_p5, %p494_p6  ;;  %p280_p2 = scmp.lt.s32.totalorder %s278_s23, %s272_s21 }
  0x3c   : > { %p275_p10 = pneg %p274_p9  ;;  %p281_p3 = por %p280_p2, %p279_p12 }
  0x3e   : > { %p282_p4 = pnand %p281_p3, %p275_p10 }
  0x40   : > { %285 = shalt.err (!%p282_p4)
}
  0x41   : > { %s286_s24 = scalar_lea.hbm %s442_s19, 128  ;;  %s290_s27 = scalar_lea.hbm %s483_s1, 256 }
  0x42   : > { %p287_p7 = scmp.ne.s32.totalorder %s442_s19, %s286_s24  ;;  %p291_p13 = scmp.lt.u32.totalorder %s442_s19, %s483_s1 }
  0x43   : > { %p292_p1 = scmp.lt.u32.totalorder %s290_s27, %s286_s24  ;;  %p294_p5 = scmp.lt.u32.totalorder %s286_s24, %s442_s19 }
  0x44   : > { %p288_p8 = pnand %p287_p7, %p494_p6 }
  0x45   : > { %p293_p0 = por %p292_p1, %p291_p13 }
  0x46   : > { %p289_p11 = pneg %p288_p8 }
  0x47   : > { %p295_p9 = por %p294_p5, %p293_p0 }
  0x49   : > { %p296_p10 = pnand %p295_p9, %p289_p11 }
  0x4b   : > { %299 = shalt.err (!%p296_p10)
}
  0x4c   : > { %198 = dma.vmem_to_hbm [thread:$0]  (%p494_p6), %s437_s11, 128, %s442_s19, %s112_s20  }
  0x4d PF: > { %p210_p12 = scmp.ge.s32.totalorder %s338_s9, 2  ;;  %s137_s30 = sand.u32 1, %s326_s6  }
  0x4e   : > { %p495_p2 = scmp.ne.s32.totalorder %s488_s17, 0  ;;  %s138_s2 = scalar_lea.sflag [#allocation4], %s137_s30 }
  0x50   : > { %p205_p3 = pnand %p210_p12, %p495_p2 }
  0x52   : > { %321 = dma.done.wait (!%p205_p3), %s138_s2, 128  }
  0x53   : > { %323 = vsyncadd (!%p205_p3), %s138_s2, 4294967168  ;;  %p12_p4 = scmp.ge.s32.totalorder %s377_s12, 4   ;;  %s496_s6 = smov %s330_s7 }
  0x54   : > { %s497_s7 = smov %s334_s8  ;;  %s498_s8 = smov %s388_s15 }
  0x55   : > { %s499_s9 = smov %s377_s12  ;;  %14 = sbr.rel (!%p12_p4) target bundleno = 4 (0x4), region = 61 }
  0x5c   :  { %143 = vsyncpa [#allocation3], 1 }
  0x5d   :  { %145 = vsyncpa [#allocation3 + $0x1], 1 }
  0x5e   :  { %146 = vsyncpa [#allocation4], 1 }
  0x5f   :  { %148 = vsyncpa [#allocation4 + $0x1], 1 }

// kernel: _mmlp_forward_impl.1
= control target key start
LH: loop header
LB: loop body
LE: loop exit
PB: predicated region body
PF: predicated region fallthrough
CT: control target
= control target key end

     0   :  { %14 = vsyncpa [#allocation3], 0  ;;  %s565_s30 = smov [#allocation2]   ;;  %s731_s0 = inlined_call_operand.vmem [shape: f32[8,32], index: 0, kind: input, shape index: {}]   ;;  %s732_s1 = inlined_call_operand.vmem [shape: f32[32,64], index: 1, kind: input, shape index: {}]   ;;  %s733_s2 = inlined_call_operand.vmem [shape: f32[1,64], index: 2, kind: input, shape index: {}]   ;;  %s734_s3 = inlined_call_operand.vmem [shape: f32[64,64], index: 3, kind: input, shape index: {}]   ;;  %s735_s4 = inlined_call_operand.vmem [shape: f32[1,64], index: 4, kind: input, shape index: {}]   ;;  %s736_s5 = inlined_call_operand.vmem [shape: f32[64,32], index: 5, kind: input, shape index: {}]   ;;  %s737_s6 = inlined_call_operand.vmem [shape: f32[1,32], index: 6, kind: input, shape index: {}]   ;;  %s738_s7 = inlined_call_operand.hbm [shape: f32[32,72], index: 7, kind: input, shape index: {}]   ;;  %s739_s8 = inlined_call_operand.vmem [shape: f32[1,72], index: 8, kind: input, shape index: {}]   ;;  %s740_s9 = inlined_call_operand.vmem [shape: f32[8,72], index: 9, kind: output, shape index: {}]  }
   0x1   :  { %s34_s10 = sshll.u32 %s565_s30, 4  ;;  %s541_s13 = scalar_lea.hbm %s738_s7, 512  ;;  %s35_s10 = int_to_ptr.vmem [resolvable:$true] %s34_s10 }
   0x2   :  { %p542_p0 = scmp.ne.s32.totalorder %s738_s7, %s541_s13  ;;  %p545_p1 = scmp.lt.u32.totalorder %s541_s13, %s738_s7 }
   0x4   :  { %p547_p2 = pnand %p545_p1, %p542_p0 }
   0x6   :  { %550 = shalt.err (!%p547_p2)
}
   0x7   :  { %s551_s18 = scalar_lea.vmem %s35_s10, 512  ;;  %p556_p4 = scmp.lt.s32.totalorder %s35_s10, %s35_s10 }
   0x8   :  { %p552_p3 = scmp.ne.s32.totalorder %s35_s10, %s551_s18  ;;  %p557_p5 = scmp.lt.s32.totalorder %s551_s18, %s551_s18 }
   0xa   :  { %p558_p6 = por %p557_p5, %p556_p4 }
   0xc   :  { %p559_p7 = pnand %p558_p6, %p552_p3 }
   0xe   :  { %562 = shalt.err (!%p559_p7)
}
   0xf   :  { %s566_s19 = smov 128   ;;  %s567_s20 = smov 8  }
  0x10   :  { %40 = dma.hbm_to_vmem [thread:$0]  %s738_s7, 512, %s35_s10, [#allocation3], %s566_s19, %s566_s19, %s567_s20  }
  0x11   :  { %563 = dma.done.wait [#allocation3], 512  }
  0x12   :  { %564 = vsyncadd [#allocation3], 4294966784  ;;  %v568_v0 = vmov 0.0|0.0   ;;  %vm569_vm0 = vmmov 0   ;;  %v570_v1 = vmov 0.0   ;;  %v47_v2 = vld [vmem:[%s732_s1] sm:$0xff] }
  0x13   :  { %499 = vmatprep.subr.bf16.mxu0 %v568_v0  ;;  %447 = vmatprep.mubr.msk.f32.mxu0 %vm569_vm0, %v570_v1  ;;  %v48_v3 = vld [vmem:[%s732_s1 + $0x8] sm:$0xff]  ;;  %v49_v4 = vld [vmem:[%s732_s1 + $0x10] sm:$0xff]  ;;  %v50_v6 = vld [vmem:[%s732_s1 + $0x18] sm:$0xff]  ;;  %vm58_vm1 = vcmask 261120   ;;  %vm148_vm2 = vcmask 523264   ;;  %vm396_vm3 = vcmask 588800  }
  0x14   :  { %505 = vmatprep.subr.bf16.mxu1 %v568_v0  ;;  %466 = vmatprep.mubr.msk.f32.mxu1 %vm569_vm0, %v570_v1  ;;  %v500_v5 = vpack.c.bf16 %v48_v3, %v47_v2  ;;  %v133_v7 = vld [vmem:[%s734_s3] sm:$0xff]  ;;  %v134_v8 = vld [vmem:[%s734_s3 + $0x8] sm:$0xff]  ;;  %v135_v9 = vld [vmem:[%s734_s3 + $0x10] sm:$0xff]  ;;  %v503_v11 = vpack.c.bf16 %v50_v6, %v49_v4 }
  0x15   :  { %v136_v10 = vld [vmem:[%s734_s3 + $0x18] sm:$0xff]  ;;  %v506_v12 = vpack.c.bf16 %v134_v8, %v133_v7  ;;  %v137_v14 = vld [vmem:[%s734_s3 + $0x20] sm:$0xff]  ;;  %v138_v15 = vld [vmem:[%s734_s3 + $0x28] sm:$0xff] }
  0x16   :  { %501 = vmatpush3.bf16.msra.mxu0 %v500_v5  ;;  %v509_v13 = vpack.c.bf16 %v136_v10, %v135_v9  ;;  %v46_v16 = vld [vmem:[%s731_s0] sm:$0xff]  ;;  %v512_v17 = vpack.c.bf16 %v138_v15, %v137_v14  ;;  %v139_v18 = vld [vmem:[%s734_s3 + $0x30] sm:$0xff]  ;;  %v140_v19 = vld [vmem:[%s734_s3 + $0x38] sm:$0xff] }
  0x17   :  { %502 = vmatprep.subr.bf16.mxu0 %v568_v0  ;;  %507 = vmatpush3.bf16.msra.mxu1 %v506_v12  ;;  %v515_v20 = vpack.c.bf16 %v140_v19, %v139_v18  ;;  %v223_v21 = vld [vmem:[%s736_s5] sm:$0xff]  ;;  %v224_v22 = vld [vmem:[%s736_s5 + $0x8] sm:$0xff]  ;;  %v225_v23 = vld [vmem:[%s736_s5 + $0x10] sm:$0xff] }
  0x18   :  { %508 = vmatprep.subr.bf16.mxu1 %v568_v0  ;;  %v518_v24 = vpack.c.bf16 %v224_v22, %v223_v21  ;;  %v226_v25 = vld [vmem:[%s736_s5 + $0x18] sm:$0xff]  ;;  %v227_v27 = vld [vmem:[%s736_s5 + $0x20] sm:$0xff]  ;;  %v228_v28 = vld [vmem:[%s736_s5 + $0x28] sm:$0xff] }
  0x19   :  { %v521_v26 = vpack.c.bf16 %v226_v25, %v225_v23  ;;  %v524_v29 = vpack.c.bf16 %v228_v28, %v227_v27  ;;  %v403_v30 = vld [vmem:[%s733_s2] ss:$0 sm:$0xff]  ;;  %v229_v35 = vld [vmem:[%s736_s5 + $0x30] sm:$0xff]  ;;  %v230_v36 = vld [vmem:[%s736_s5 + $0x38] sm:$0xff] }
  0x1a   :  { %504 = vmatpush3.bf16.msra.mxu0 %v503_v11  ;;  %v527_v37 = vpack.c.bf16 %v230_v36, %v229_v35  ;;  %v312_v38 = vld [vmem:[#allocation2] sm:$0xff]  ;;  %v313_v39 = vld [vmem:[#allocation2 + $0x8] sm:$0xff]  ;;  %v314_v46 = vld [vmem:[#allocation2 + $0x10] sm:$0xff] }
  0x1b   :  { %517 = vmatprep.subr.bf16.mxu0 %v568_v0  ;;  %510 = vmatpush3.bf16.msra.mxu1 %v509_v13  ;;  %v530_v40 = vpack.c.bf16 %v313_v39, %v312_v38  ;;  %v405_v41 = vld [vmem:[%s735_s4] ss:$0 sm:$0xff]  ;;  %v315_v47 = vld [vmem:[#allocation2 + $0x18] sm:$0xff] }
  0x1c   :  { %511 = vmatprep.subr.bf16.mxu1 %v568_v0  ;;  %v533_v48 = vpack.c.bf16 %v315_v47, %v314_v46  ;;  %v407_v49 = vld [vmem:[%s737_s6] ss:$0 sm:$0xff] }
  0x1d   :  { %448 = vmatmul.mubr.msk.f32.vlgmr.msra.gmra.mrb[0].mxu0 %vm58_vm1, %v46_v16  ;;  %v409_v54 = vld [vmem:[%s739_s8] ss:$0 sm:$0xff] }
  0x1e   :  { %485 = vmatprep.mubr.msk.f32.mxu0 %vm569_vm0, %v570_v1  ;;  %519 = vmatpush3.bf16.msra.mxu0 %v518_v24 }
  0x1f   :  { %513 = vmatpush3.bf16.msra.mxu1 %v512_v17  ;;  %520 = vmatprep.subr.bf16.mxu0 %v568_v0 }
  0x20   :  { %514 = vmatprep.subr.bf16.mxu1 %v568_v0 }
  0x22   :  { %522 = vmatpush3.bf16.msra.mxu0 %v521_v26 }
  0x23   :  { %516 = vmatpush3.bf16.msra.mxu1 %v515_v20  ;;  %523 = vmatprep.subr.bf16.mxu0 %v568_v0 }
  0x24   :  { %529 = vmatprep.subr.bf16.mxu1 %v568_v0 }
  0x26   :  { %525 = vmatpush3.bf16.msra.mxu0 %v524_v29 }
  0x27   :  { %526 = vmatprep.subr.bf16.mxu0 %v568_v0 }
  0x2a   :  { %528 = vmatpush3.bf16.msra.mxu0 %v527_v37 }
  0xf0   :  { %v128_v31 = vpop.f32.mrb[0].mxu0 }
  0xf1   :  { %v129_v32 = vadd.f32 %v403_v30, %v128_v31  ;;  %v449_v33 = vpop.f32.mrb[1].mxu0 }
  0xf3   :  { %v132_v34 = vmax.f32 %v129_v32, 0.0 }
  0xf5   :  { %467 = vmatmul.mubr.msk.f32.vlgmr.msra.gmra.mrb[0].mxu1 %vm148_vm2, %v132_v34 }
  0xf6   :  { %496 = vmatprep.mubr.msk.f32.mxu1 %vm569_vm0, %v570_v1  ;;  %531 = vmatpush3.bf16.msra.mxu1 %v530_v40 }
  0xf7   :  { %532 = vmatprep.subr.bf16.mxu1 %v568_v0 }
  0xfa   :  { %534 = vmatpush3.bf16.msra.mxu1 %v533_v48 }
 0x1c8   :  { %v218_v42 = vpop.f32.mrb[0].mxu1 }
 0x1c9   :  { %v219_v43 = vadd.f32 %v405_v41, %v218_v42  ;;  %v468_v44 = vpop.f32.mrb[1].mxu1 }
 0x1cb   :  { %v222_v45 = vmax.f32 %v219_v43, 0.0 }
 0x1cd   :  { %486 = vmatmul.mubr.msk.f32.vlgmr.msra.gmra.mrb[2].mxu0 %vm148_vm2, %v222_v45 }
 0x2a0   :  { %v307_v50 = vpop.f32.mrb[2].mxu0 }
 0x2a1   :  { %v308_v51 = vadd.f32 %v407_v49, %v307_v50  ;;  %v487_v52 = vpop.f32.mrb[3].mxu0 }
 0x2a3   :  { %v311_v53 = vmax.f32 %v308_v51, 0.0 }
 0x2a5   :  { %497 = vmatmul.mubr.msk.f32.vlgmr.msra.gmra.mrb[2].mxu1 %vm58_vm1, %v311_v53 }
 0x378   :  { %v392_v55 = vpop.f32.mrb[2].mxu1 }
 0x379   :  { %v393_v56 = vadd.f32 %v409_v54, %v392_v55  ;;  %v498_v57 = vpop.f32.mrb[3].mxu1 }
 0x37b   :  { %397 = vst.msk [vmem:[%s740_s9] sm:$0xff] %vm396_vm3, %v393_v56 }
 0x37c   :  { %402 = vsyncpa [#allocation3], 1 }

</bundles_post_ra>
